<compile_context>
chip_gen: v6e
topology: v6e:2x2x1
jax: 0.10.0
libtpu: 0.0.40
codegen_flags: <defaults>
</compile_context>

<pallas_src>
import functools

import jax
import jax.numpy as jnp
from jax import lax
from jax.experimental import pallas as pl
from jax.experimental.pallas import tpu as pltpu


# ----------------------------------------------------------------------------
# Fused kernel: conv1(3x3,s1,p1)+ReLU -> conv2(3x3,s2,p1)+ReLU -> avgpool -> fc
# One grid step == `nb` batch elements, end to end.
# ----------------------------------------------------------------------------
def _divit_fused_kernel(x_ref, w1b_ref, b1_ref, w2b_ref, b2_ref, wfc_ref, bfc_ref,
                        feat_ref, logits_ref, *, nb, ph, pw, wc, c1, c2):
    # x_ref    : (nb, 2, GH, Wp*Cin) bf16  row-parity-split, spatially padded input
    #            x_ref[n, g, m, x*Cin + c] == xpad[n, 2m+g, x, c]
    # w1b_ref  : (3*Wp*Cin, 2*pw*C1) bf16  conv1 as a block-banded matmul
    # b1_ref   : (1, 2*pw*C1)        f32
    # w2b_ref  : (3*2*pw*C1, pw*C2)  bf16  conv2 (stride 2) as a block-banded matmul
    # b2_ref   : (1, pw*C2)          f32
    # wfc_ref  : (pw*C2, NC)         f32   fc weight tiled over pw, pre-scaled 1/(ph*pw)
    # bfc_ref  : (1, NC)             f32
    # feat_ref : (nb, ph, pw*C2)     f32   lanes = (out col, C2)  (lane-dense)
    # logits_ref: (1, nb, NC)        f32
    f32 = jnp.float32
    bf16 = jnp.bfloat16
    n1 = 2 * pw * c1
    m = nb * ph

    # conv1 for one output-row parity `a`, as a single MXU dot.
    #   LHS rows  = (image, output row);  LHS lanes = (row tap i, padded col x, Cin)
    #   out lanes = (col parity b, out col l', C1)  -> exactly the layout conv2 needs.
    def conv1(a):
        pieces = []
        for i in range(3):
            u = 1 - a + i              # padded-input row offset of row-tap i
            g, off = u % 2, u // 2     # row-parity grid / row offset inside it
            pieces.append(x_ref[:, g, off:off + ph, :])          # (nb, ph, Wp*Cin)
        lhs = jnp.concatenate(pieces, axis=-1).reshape(m, 3 * wc)
        acc = jnp.dot(lhs, w1b_ref[...], preferred_element_type=f32)
        h = jnp.maximum(acc + b1_ref[...], 0.0)                  # (m, 2*pw*C1) f32
        return h.reshape(nb, ph, n1).astype(bf16)

    h0 = conv1(0)   # even-row plane of padded conv1 output, rows 1..ph
    h1 = conv1(1)   # odd-row plane,                          rows 0..ph-1

    # conv2 (stride 2) as one dot: row-tap i selects a plane + row shift;
    # the column taps live in the banded weight.  Top zero border for tap i=0.
    zrow = jnp.zeros((nb, 1, n1), bf16)
    piece0 = jnp.concatenate([zrow, h0[:, :ph - 1, :]], axis=1)  # (nb, ph, n1)
    lhs2 = jnp.concatenate([piece0, h1, h0], axis=-1).reshape(m, 3 * n1)
    acc2 = jnp.dot(lhs2, w2b_ref[...], preferred_element_type=f32)
    feat = jnp.maximum(acc2 + b2_ref[...], 0.0).reshape(nb, ph, pw * c2)
    feat_ref[...] = feat

    # AdaptiveAvgPool2d((1,1)) + flatten + Linear: the per-column sum and the
    # 1/(ph*pw) scale are folded into wfc, so only the row sum is explicit.
    pooled = jnp.sum(feat, axis=1)                               # (nb, pw*C2)
    logits_ref[0] = (jnp.dot(pooled, wfc_ref[...], preferred_element_type=f32)
                     + bfc_ref[...])


# ----------------------------------------------------------------------------
# Wrapper: layout plumbing + banded-weight construction + pallas_call.
# ----------------------------------------------------------------------------
def _banded_weights(w1, b1, w2, b2, w_fc, b_fc, *, ph, pw, cin, c1, c2, nc, wp):
    f32, bf16 = jnp.float32, jnp.bfloat16

    # conv1: W1_band[(i, x, cin), (b, l', c1)] = W1[i, j, cin, c1],  j = x - (2l'+1-b)
    x_idx = jnp.arange(wp)
    b_idx = jnp.arange(2)
    lp_idx = jnp.arange(pw)
    out_col = 2 * lp_idx[None, :] + 1 - b_idx[:, None]                 # (2, pw)
    j1 = x_idx[:, None, None] - out_col[None, :, :]                    # (wp, 2, pw)
    sel1 = (j1[..., None] == jnp.arange(3)).astype(f32)                # (wp, 2, pw, 3)
    w1b = jnp.einsum("xbpj,ijkc->ixkbpc", sel1, w1.astype(f32))
    w1b = w1b.reshape(3 * wp * cin, 2 * pw * c1).astype(bf16)
    b1t = jnp.tile(b1.astype(f32), 2 * pw).reshape(1, 2 * pw * c1)

    # conv2: W2_band[(i, b, l', c1), (c2, ch)] = W2[i, j, c1, ch],
    #        plane col l = l'+1-b, j = 2*(l - c2) + b
    l_grid = lp_idx[None, :] + 1 - b_idx[:, None]                      # (2, pw)
    c2_idx = jnp.arange(pw)
    j2 = 2 * (l_grid[:, :, None] - c2_idx[None, None, :]) + b_idx[:, None, None]
    sel2 = (j2[..., None] == jnp.arange(3)).astype(f32)                # (2, pw, pw, 3)
    w2b = jnp.einsum("bpcj,ijkd->ibpkcd", sel2, w2.astype(f32))
    w2b = w2b.reshape(3 * 2 * pw * c1, pw * c2).astype(bf16)
    b2t = jnp.tile(b2.astype(f32), pw).reshape(1, pw * c2)

    # fc: tile over the pw output columns and fold in the avg-pool scale.
    wfct = jnp.tile(w_fc.astype(f32), (pw, 1)) * (1.0 / float(ph * pw))
    bfct = b_fc.astype(f32).reshape(1, nc)
    return w1b, b1t, w2b, b2t, wfct, bfct


def divit_forward_pallas(params, x_nchw, *, block_n=8):
    w1, b1 = params["w1"], params["b1"]
    w2, b2 = params["w2"], params["b2"]
    w_fc, b_fc = params["w_fc"], params["b_fc"]

    N, Cin, H, W = x_nchw.shape
    assert H % 2 == 0 and W % 2 == 0, "stride-2 stage expects even spatial dims"
    C1, C2, NC = w1.shape[-1], w2.shape[-1], w_fc.shape[-1]
    ph, pw = H // 2, W // 2
    GH, Wp = ph + 1, W + 2
    WC = Wp * Cin

    # Batch block: fat M, but keep >= 2 grid steps so both v7x TCs get work.
    nb = max(1, min(block_n, N))
    while nb > 1 and -(-N // nb) < 2:
        nb //= 2
    nblk = -(-N // nb)
    Np = nblk * nb

    # Input prep (pure layout, all in bf16): NCHW -> NHWC -> pad -> row-parity
    # split -> flatten (Wp, Cin) so the block trails (GH, Wp*Cin).
    x = jnp.transpose(x_nchw, (0, 2, 3, 1)).astype(jnp.bfloat16)
    if Np != N:
        x = jnp.pad(x, ((0, Np - N), (0, 0), (0, 0), (0, 0)))
    xp = jnp.pad(x, ((0, 0), (1, 1), (1, 1), (0, 0)))                 # (Np, H+2, Wp, Cin)
    xr = (xp.reshape(Np, GH, 2, Wp, Cin).transpose(0, 2, 1, 3, 4)
            .reshape(Np, 2, GH, WC))                                  # (Np, 2, GH, Wp*Cin)

    w1b, b1t, w2b, b2t, wfct, bfct = _banded_weights(
        w1, b1, w2, b2, w_fc, b_fc,
        ph=ph, pw=pw, cin=Cin, c1=C1, c2=C2, nc=NC, wp=Wp)

    n1, n2 = 2 * pw * C1, pw * C2
    m = nb * ph
    flops = nblk * 2 * (2 * m * (3 * WC) * n1 + m * (3 * n1) * n2 + nb * n2 * NC)
    bytes_accessed = (Np * 2 * GH * WC * 2 + 3 * WC * n1 * 2 + 3 * n1 * n2 * 2
                      + (n1 + n2 + NC + n2 * NC) * 4
                      + Np * ph * n2 * 4 + Np * NC * 4)

    kernel = functools.partial(_divit_fused_kernel, nb=nb, ph=ph, pw=pw,
                               wc=WC, c1=C1, c2=C2)

    feat_flat, logits3 = pl.pallas_call(
        kernel,
        out_shape=(jax.ShapeDtypeStruct((Np, ph, n2), jnp.float32),
                   jax.ShapeDtypeStruct((nblk, nb, NC), jnp.float32)),
        grid=(nblk,),
        in_specs=[
            pl.BlockSpec((nb, 2, GH, WC), lambda b: (b, 0, 0, 0)),
            pl.BlockSpec((3 * WC, n1), lambda b: (0, 0)),
            pl.BlockSpec((1, n1), lambda b: (0, 0)),
            pl.BlockSpec((3 * n1, n2), lambda b: (0, 0)),
            pl.BlockSpec((1, n2), lambda b: (0, 0)),
            pl.BlockSpec((n2, NC), lambda b: (0, 0)),
            pl.BlockSpec((1, NC), lambda b: (0, 0)),
        ],
        out_specs=(
            pl.BlockSpec((nb, ph, n2), lambda b: (b, 0, 0)),
            pl.BlockSpec((1, nb, NC), lambda b: (b, 0, 0)),
        ),
        compiler_params=pltpu.CompilerParams(
            dimension_semantics=("parallel",),
            vmem_limit_bytes=32 * 1024 * 1024),
        cost_estimate=pl.CostEstimate(flops=flops, transcendentals=0,
                                      bytes_accessed=bytes_accessed),
    )(xr, w1b, b1t, w2b, b2t, wfct, bfct)

    logits = logits3.reshape(Np, NC)[:N]
    features = feat_flat[:N].reshape(N, ph, pw, C2).transpose(0, 3, 1, 2)  # NCHW
    return logits, features


@jax.jit
def divit_forward(params, x_nchw):
    return divit_forward_pallas(params, x_nchw)


# ----------------------------------------------------------------------------
# Parameters (fc: kaiming_normal fan_out, zero bias — as in the PyTorch module)
# and a pure-JAX reference with the same bf16-operand / f32-accum numerics.
# ----------------------------------------------------------------------------
def init_divit_params(key, in_ch=3, mid_ch=8, feat_ch=16, num_classes=5):
    k1, k2, k3 = jax.random.split(key, 3)
    w1 = jax.random.normal(k1, (3, 3, in_ch, mid_ch), jnp.float32) * (
        (2.0 / (3 * 3 * in_ch)) ** 0.5)
    b1 = jnp.zeros((mid_ch,), jnp.float32)
    w2 = jax.random.normal(k2, (3, 3, mid_ch, feat_ch), jnp.float32) * (
        (2.0 / (3 * 3 * mid_ch)) ** 0.5)
    b2 = jnp.zeros((feat_ch,), jnp.float32)
    w_fc = jax.random.normal(k3, (feat_ch, num_classes), jnp.float32) * (
        (2.0 / num_classes) ** 0.5)
    b_fc = jnp.zeros((num_classes,), jnp.float32)
    return dict(w1=w1, b1=b1, w2=w2, b2=b2, w_fc=w_fc, b_fc=b_fc)


def divit_reference(params, x_nchw):
    x = jnp.transpose(x_nchw, (0, 2, 3, 1))

    def conv(x, w, b, stride, pad):
        y = lax.conv_general_dilated(
            x.astype(jnp.bfloat16), w.astype(jnp.bfloat16),
            (stride, stride), [(pad, pad), (pad, pad)],
            dimension_numbers=("NHWC", "HWIO", "NHWC"),
            preferred_element_type=jnp.float32)
        return jax.nn.relu(y + b)

    h = conv(x, params["w1"], params["b1"], 1, 1)
    feat = conv(h, params["w2"], params["b2"], 2, 1)
    pooled = feat.mean(axis=(1, 2))
    logits = pooled @ params["w_fc"] + params["b_fc"]
    return logits, jnp.transpose(feat, (0, 3, 1, 2))


if __name__ == "__main__":
    key = jax.random.PRNGKey(0)
    k_param, k_x = jax.random.split(key)

    # batch=8, channels=3, spatial=16x16, num_classes=5 (NCHW like PyTorch).
    x = jax.random.normal(k_x, (8, 3, 16, 16), jnp.float32)
    params = init_divit_params(k_param, in_ch=3, mid_ch=8, feat_ch=16,
                               num_classes=5)

    logits, features = divit_forward(params, x)
    jax.block_until_ready((logits, features))

    ref_logits, ref_features = divit_reference(params, x)
    assert logits.shape == (8, 5), logits.shape
    assert features.shape == (8, 16, 8, 8), features.shape
    assert jnp.allclose(logits, ref_logits, rtol=1e-2, atol=1e-2), (
        float(jnp.max(jnp.abs(logits - ref_logits))))
    assert jnp.allclose(features, ref_features, rtol=1e-2, atol=1e-2), (
        float(jnp.max(jnp.abs(features - ref_features))))

    print("KERNEL_OK")
</pallas_src>

<mosaic_0001>
module attributes {stable_mosaic.version = 11 : i64} {
  func.func @_divit_fused_kernel(%arg0: i32, %arg1: memref<4x2x9x54xbf16, #tpu.memory_space<vmem>>, %arg2: memref<162x128xbf16, #tpu.memory_space<vmem>>, %arg3: memref<1x128xf32, #tpu.memory_space<vmem>>, %arg4: memref<384x128xbf16, #tpu.memory_space<vmem>>, %arg5: memref<1x128xf32, #tpu.memory_space<vmem>>, %arg6: memref<128x5xf32, #tpu.memory_space<vmem>>, %arg7: memref<1x5xf32, #tpu.memory_space<vmem>>, %arg8: memref<4x8x128xf32, #tpu.memory_space<vmem>>, %arg9: memref<1x4x5xf32, #tpu.memory_space<vmem>>) attributes {dimension_semantics = [#tpu.dimension_semantics<parallel>], iteration_bounds = array<i64: 2>, scalar_prefetch = 0 : i64, scratch_operands = 0 : i64, tpu.core_type = #tpu.core_type<tc>, window_params = [{transform_indices = @transform_0, window_bounds = array<i64: 4, 2, 9, 54>}, {pipeline_mode = #tpu.pipeline_mode<synchronous>, transform_indices = @transform_1, window_bounds = array<i64: 162, 128>}, {pipeline_mode = #tpu.pipeline_mode<synchronous>, transform_indices = @transform_2, window_bounds = array<i64: 1, 128>}, {pipeline_mode = #tpu.pipeline_mode<synchronous>, transform_indices = @transform_3, window_bounds = array<i64: 384, 128>}, {pipeline_mode = #tpu.pipeline_mode<synchronous>, transform_indices = @transform_4, window_bounds = array<i64: 1, 128>}, {pipeline_mode = #tpu.pipeline_mode<synchronous>, transform_indices = @transform_5, window_bounds = array<i64: 128, 5>}, {pipeline_mode = #tpu.pipeline_mode<synchronous>, transform_indices = @transform_6, window_bounds = array<i64: 1, 5>}, {transform_indices = @transform_7, window_bounds = array<i64: 4, 8, 128>}, {transform_indices = @transform_8, window_bounds = array<i64: 1, 4, 5>}]} {
    %c0 = arith.constant 0 : index
    %c1 = arith.constant 1 : index
    %c0_0 = arith.constant 0 : index
    %c0_1 = arith.constant 0 : index
    %0 = vector.load %arg1[%c0, %c1, %c0_0, %c0_1] : memref<4x2x9x54xbf16, #tpu.memory_space<vmem>>, vector<4x1x8x54xbf16>
    %1 = vector.shape_cast %0 : vector<4x1x8x54xbf16> to vector<4x8x54xbf16>
    %c0_2 = arith.constant 0 : index
    %c0_3 = arith.constant 0 : index
    %c1_4 = arith.constant 1 : index
    %c0_5 = arith.constant 0 : index
    %2 = vector.load %arg1[%c0_2, %c0_3, %c1_4, %c0_5] : memref<4x2x9x54xbf16, #tpu.memory_space<vmem>>, vector<4x1x8x54xbf16>
    %3 = vector.shape_cast %2 : vector<4x1x8x54xbf16> to vector<4x8x54xbf16>
    %c0_6 = arith.constant 0 : index
    %c1_7 = arith.constant 1 : index
    %c1_8 = arith.constant 1 : index
    %c0_9 = arith.constant 0 : index
    %4 = vector.load %arg1[%c0_6, %c1_7, %c1_8, %c0_9] : memref<4x2x9x54xbf16, #tpu.memory_space<vmem>>, vector<4x1x8x54xbf16>
    %5 = vector.shape_cast %4 : vector<4x1x8x54xbf16> to vector<4x8x54xbf16>
    %6 = tpu.concatenate %1, %3, %5 in 2 : vector<4x8x54xbf16>, vector<4x8x54xbf16>, vector<4x8x54xbf16> -> vector<4x8x162xbf16>
    %7 = vector.shape_cast %6 : vector<4x8x162xbf16> to vector<32x162xbf16>
    %c0_10 = arith.constant 0 : index
    %c0_11 = arith.constant 0 : index
    %8 = vector.load %arg2[%c0_10, %c0_11] : memref<162x128xbf16, #tpu.memory_space<vmem>>, vector<162x128xbf16>
    %cst = arith.constant dense<0.000000e+00> : vector<32x128xf32>
    %9 = tpu.matmul %7, %8, %cst {dimension_numbers = #tpu.dot_dimension_numbers<[1], [0], [0], [1], [0, 0, 1, 1], [], []>} : vector<32x162xbf16>, vector<162x128xbf16>, vector<32x128xf32> -> vector<32x128xf32>
    %c0_12 = arith.constant 0 : index
    %c0_13 = arith.constant 0 : index
    %10 = vector.load %arg3[%c0_12, %c0_13] : memref<1x128xf32, #tpu.memory_space<vmem>>, vector<1x128xf32>
    %11 = vector.broadcast %10 : vector<1x128xf32> to vector<32x128xf32>
    %12 = arith.addf %9, %11 : vector<32x128xf32>
    %cst_14 = arith.constant 0.000000e+00 : f32
    %13 = vector.broadcast %cst_14 : f32 to vector<32x128xf32>
    %14 = arith.maximumf %12, %13 : vector<32x128xf32>
    %15 = vector.shape_cast %14 : vector<32x128xf32> to vector<4x8x128xf32>
    %16 = arith.truncf %15 : vector<4x8x128xf32> to vector<4x8x128xbf16>
    %c0_15 = arith.constant 0 : index
    %c0_16 = arith.constant 0 : index
    %c0_17 = arith.constant 0 : index
    %c0_18 = arith.constant 0 : index
    %17 = vector.load %arg1[%c0_15, %c0_16, %c0_17, %c0_18] : memref<4x2x9x54xbf16, #tpu.memory_space<vmem>>, vector<4x1x8x54xbf16>
    %18 = vector.shape_cast %17 : vector<4x1x8x54xbf16> to vector<4x8x54xbf16>
    %c0_19 = arith.constant 0 : index
    %c1_20 = arith.constant 1 : index
    %c0_21 = arith.constant 0 : index
    %c0_22 = arith.constant 0 : index
    %19 = vector.load %arg1[%c0_19, %c1_20, %c0_21, %c0_22] : memref<4x2x9x54xbf16, #tpu.memory_space<vmem>>, vector<4x1x8x54xbf16>
    %20 = vector.shape_cast %19 : vector<4x1x8x54xbf16> to vector<4x8x54xbf16>
    %c0_23 = arith.constant 0 : index
    %c0_24 = arith.constant 0 : index
    %c1_25 = arith.constant 1 : index
    %c0_26 = arith.constant 0 : index
    %21 = vector.load %arg1[%c0_23, %c0_24, %c1_25, %c0_26] : memref<4x2x9x54xbf16, #tpu.memory_space<vmem>>, vector<4x1x8x54xbf16>
    %22 = vector.shape_cast %21 : vector<4x1x8x54xbf16> to vector<4x8x54xbf16>
    %23 = tpu.concatenate %18, %20, %22 in 2 : vector<4x8x54xbf16>, vector<4x8x54xbf16>, vector<4x8x54xbf16> -> vector<4x8x162xbf16>
    %24 = vector.shape_cast %23 : vector<4x8x162xbf16> to vector<32x162xbf16>
    %c0_27 = arith.constant 0 : index
    %c0_28 = arith.constant 0 : index
    %25 = vector.load %arg2[%c0_27, %c0_28] : memref<162x128xbf16, #tpu.memory_space<vmem>>, vector<162x128xbf16>
    %cst_29 = arith.constant dense<0.000000e+00> : vector<32x128xf32>
    %26 = tpu.matmul %24, %25, %cst_29 {dimension_numbers = #tpu.dot_dimension_numbers<[1], [0], [0], [1], [0, 0, 1, 1], [], []>} : vector<32x162xbf16>, vector<162x128xbf16>, vector<32x128xf32> -> vector<32x128xf32>
    %c0_30 = arith.constant 0 : index
    %c0_31 = arith.constant 0 : index
    %27 = vector.load %arg3[%c0_30, %c0_31] : memref<1x128xf32, #tpu.memory_space<vmem>>, vector<1x128xf32>
    %28 = vector.broadcast %27 : vector<1x128xf32> to vector<32x128xf32>
    %29 = arith.addf %26, %28 : vector<32x128xf32>
    %cst_32 = arith.constant 0.000000e+00 : f32
    %30 = vector.broadcast %cst_32 : f32 to vector<32x128xf32>
    %31 = arith.maximumf %29, %30 : vector<32x128xf32>
    %32 = vector.shape_cast %31 : vector<32x128xf32> to vector<4x8x128xf32>
    %33 = arith.truncf %32 : vector<4x8x128xf32> to vector<4x8x128xbf16>
    %cst_33 = arith.constant 0.000000e+00 : bf16
    %34 = vector.broadcast %cst_33 : bf16 to vector<4x1x128xbf16>
    %35 = vector.extract_strided_slice %16 {offsets = [0, 0, 0], sizes = [4, 7, 128], strides = [1, 1, 1]} : vector<4x8x128xbf16> to vector<4x7x128xbf16>
    %36 = tpu.concatenate %34, %35 in 1 : vector<4x1x128xbf16>, vector<4x7x128xbf16> -> vector<4x8x128xbf16>
    %37 = tpu.concatenate %36, %33, %16 in 2 : vector<4x8x128xbf16>, vector<4x8x128xbf16>, vector<4x8x128xbf16> -> vector<4x8x384xbf16>
    %38 = vector.shape_cast %37 : vector<4x8x384xbf16> to vector<32x384xbf16>
    %c0_34 = arith.constant 0 : index
    %c0_35 = arith.constant 0 : index
    %39 = vector.load %arg4[%c0_34, %c0_35] : memref<384x128xbf16, #tpu.memory_space<vmem>>, vector<384x128xbf16>
    %cst_36 = arith.constant dense<0.000000e+00> : vector<32x128xf32>
    %40 = tpu.matmul %38, %39, %cst_36 {dimension_numbers = #tpu.dot_dimension_numbers<[1], [0], [0], [1], [0, 0, 1, 1], [], []>} : vector<32x384xbf16>, vector<384x128xbf16>, vector<32x128xf32> -> vector<32x128xf32>
    %c0_37 = arith.constant 0 : index
    %c0_38 = arith.constant 0 : index
    %41 = vector.load %arg5[%c0_37, %c0_38] : memref<1x128xf32, #tpu.memory_space<vmem>>, vector<1x128xf32>
    %42 = vector.broadcast %41 : vector<1x128xf32> to vector<32x128xf32>
    %43 = arith.addf %40, %42 : vector<32x128xf32>
    %cst_39 = arith.constant 0.000000e+00 : f32
    %44 = vector.broadcast %cst_39 : f32 to vector<32x128xf32>
    %45 = arith.maximumf %43, %44 : vector<32x128xf32>
    %46 = vector.shape_cast %45 : vector<32x128xf32> to vector<4x8x128xf32>
    %c0_40 = arith.constant 0 : index
    %c0_41 = arith.constant 0 : index
    %c0_42 = arith.constant 0 : index
    %47 = vector.load %arg8[%c0_40, %c0_41, %c0_42] : memref<4x8x128xf32, #tpu.memory_space<vmem>>, vector<4x8x128xf32>
    tpu.vector_store %arg8[%c0_40, %c0_41, %c0_42], %46 {strides = array<i32>} : memref<4x8x128xf32, #tpu.memory_space<vmem>>, vector<4x8x128xf32>,
    %cst_43 = arith.constant dense<0.000000e+00> : vector<4x128xf32>
    %48 = vector.multi_reduction <add>, %46, %cst_43 [1] : vector<4x8x128xf32> to vector<4x128xf32>
    %c0_44 = arith.constant 0 : index
    %c0_45 = arith.constant 0 : index
    %49 = vector.load %arg6[%c0_44, %c0_45] : memref<128x5xf32, #tpu.memory_space<vmem>>, vector<128x5xf32>
    %cst_46 = arith.constant dense<0.000000e+00> : vector<4x5xf32>
    %50 = tpu.matmul %48, %49, %cst_46 {dimension_numbers = #tpu.dot_dimension_numbers<[1], [0], [0], [1], [0, 0, 1, 1], [], []>} : vector<4x128xf32>, vector<128x5xf32>, vector<4x5xf32> -> vector<4x5xf32>
    %c0_47 = arith.constant 0 : index
    %c0_48 = arith.constant 0 : index
    %51 = vector.load %arg7[%c0_47, %c0_48] : memref<1x5xf32, #tpu.memory_space<vmem>>, vector<1x5xf32>
    %52 = vector.broadcast %51 : vector<1x5xf32> to vector<4x5xf32>
    %53 = arith.addf %50, %52 : vector<4x5xf32>
    %c0_49 = arith.constant 0 : index
    %c0_50 = arith.constant 0 : index
    %c0_51 = arith.constant 0 : index
    %54 = vector.load %arg9[%c0_49, %c0_50, %c0_51] : memref<1x4x5xf32, #tpu.memory_space<vmem>>, vector<1x4x5xf32>
    %55 = vector.shape_cast %54 : vector<1x4x5xf32> to vector<4x5xf32>
    %56 = vector.shape_cast %53 : vector<4x5xf32> to vector<1x4x5xf32>
    tpu.vector_store %arg9[%c0_49, %c0_50, %c0_51], %56 {strides = array<i32>} : memref<1x4x5xf32, #tpu.memory_space<vmem>>, vector<1x4x5xf32>,
    return
  }
  func.func @transform_0(%arg0: i32) -> (i32, i32, i32, i32) {
    %c0_i32 = arith.constant 0 : i32
    %c0_i32_0 = arith.constant 0 : i32
    %c0_i32_1 = arith.constant 0 : i32
    %c0_i32_2 = arith.constant 0 : i32
    return %arg0, %c0_i32, %c0_i32_0, %c0_i32_1 : i32, i32, i32, i32
  }
  func.func @transform_1(%arg0: i32) -> (i32, i32) {
    %c0_i32 = arith.constant 0 : i32
    %c0_i32_0 = arith.constant 0 : i32
    %c0_i32_1 = arith.constant 0 : i32
    return %c0_i32, %c0_i32_0 : i32, i32
  }
  func.func @transform_2(%arg0: i32) -> (i32, i32) {
    %c0_i32 = arith.constant 0 : i32
    %c0_i32_0 = arith.constant 0 : i32
    %c0_i32_1 = arith.constant 0 : i32
    return %c0_i32, %c0_i32_0 : i32, i32
  }
  func.func @transform_3(%arg0: i32) -> (i32, i32) {
    %c0_i32 = arith.constant 0 : i32
    %c0_i32_0 = arith.constant 0 : i32
    %c0_i32_1 = arith.constant 0 : i32
    return %c0_i32, %c0_i32_0 : i32, i32
  }
  func.func @transform_4(%arg0: i32) -> (i32, i32) {
    %c0_i32 = arith.constant 0 : i32
    %c0_i32_0 = arith.constant 0 : i32
    %c0_i32_1 = arith.constant 0 : i32
    return %c0_i32, %c0_i32_0 : i32, i32
  }
  func.func @transform_5(%arg0: i32) -> (i32, i32) {
    %c0_i32 = arith.constant 0 : i32
    %c0_i32_0 = arith.constant 0 : i32
    %c0_i32_1 = arith.constant 0 : i32
    return %c0_i32, %c0_i32_0 : i32, i32
  }
  func.func @transform_6(%arg0: i32) -> (i32, i32) {
    %c0_i32 = arith.constant 0 : i32
    %c0_i32_0 = arith.constant 0 : i32
    %c0_i32_1 = arith.constant 0 : i32
    return %c0_i32, %c0_i32_0 : i32, i32
  }
  func.func @transform_7(%arg0: i32) -> (i32, i32, i32) {
    %c0_i32 = arith.constant 0 : i32
    %c0_i32_0 = arith.constant 0 : i32
    %c0_i32_1 = arith.constant 0 : i32
    return %arg0, %c0_i32, %c0_i32_0 : i32, i32, i32
  }
  func.func @transform_8(%arg0: i32) -> (i32, i32, i32) {
    %c0_i32 = arith.constant 0 : i32
    %c0_i32_0 = arith.constant 0 : i32
    %c0_i32_1 = arith.constant 0 : i32
    return %arg0, %c0_i32, %c0_i32_0 : i32, i32, i32
  }
}

</mosaic_0001>

<bundles_post_ra>
// kernel: tile.18
= control target key start
LH: loop header
LB: loop body
LE: loop exit
PB: predicated region body
PF: predicated region fallthrough
CT: control target
= control target key end

     0   :  { %s28_s0 = inlined_call_operand.vmem [shape: f32[8], index: 0, kind: input, shape index: {}]   ;;  %s29_s1 = inlined_call_operand.vmem [shape: f32[16,8], index: 1, kind: output, shape index: {}]  }
   0x1   :  { %v4_v0 = vld [vmem:[%s28_s0] ss:$0 sm:$0xff] }
   0x2   :  { %5 = vst [vmem:[%s29_s1] sm:$0xff] %v4_v0  ;;  %8 = vst [vmem:[%s29_s1 + $0x8] sm:$0xff] %v4_v0 }

// kernel: tile.19
= control target key start
LH: loop header
LB: loop body
LE: loop exit
PB: predicated region body
PF: predicated region fallthrough
CT: control target
= control target key end

     0   :  { %s133_s10 = smov 120   ;;  %s134_s11 = smov 104   ;;  %vm3_vm0 = vcmask 64512   ;;  %vm9_vm1 = vcmask 1048512   ;;  %vm15_vm2 = vcmask 982912   ;;  %vm21_vm3 = vcmask 917312   ;;  %s209_s0 = inlined_call_operand.vmem [shape: f32[16,8], index: 0, kind: input, shape index: {}]   ;;  %s210_s1 = inlined_call_operand.vmem [shape: f32[1,128], index: 1, kind: output, shape index: {}]  }
   0x1   :  { %v103_v0 = vld [vmem:[%s209_s0 + $0xf] sm:$0x1]   ;;  %v105_v1 = vld [vmem:[%s209_s0 + $0xd] sm:$0x1]   ;;  %v104_v2 = vld [vmem:[%s209_s0 + $0xe] sm:$0x1]  }
   0x2   :  { %7 = vrot.lane.b32.xlu0 %v103_v0, %s133_s10  ;;  %19 = vrot.lane.b32.xlu1 %v105_v1, %s134_s11  ;;  %v106_v3 = vld [vmem:[%s209_s0 + $0xc] sm:$0x1]   ;;  %s135_s16 = smov 112   ;;  %s136_s17 = smov 96   ;;  %v107_v4 = vld [vmem:[%s209_s0 + $0xb] sm:$0x1]  }
   0x3   :  { %v108_v5 = vld [vmem:[%s209_s0 + $0xa] sm:$0x1]   ;;  %v2_v6 = vld [vmem:[%s209_s0] sm:$0x1]   ;;  %s137_s24 = smov 88   ;;  %s138_s25 = smov 80  }
   0x4   :  { %4 = vst.msk [vmem:[#allocation0] sm:$0x1] %vm3_vm0, %v2_v6   ;;  %v109_v7 = vld [vmem:[%s209_s0 + $0x9] sm:$0x1]   ;;  %v110_v8 = vld [vmem:[%s209_s0 + $0x8] sm:$0x1]  }
   0x5   :  { %s139_s30 = smov 72   ;;  %s140_s2 = smov 64   ;;  %v111_v9 = vld [vmem:[%s209_s0 + $0x7] sm:$0x1]   ;;  %v112_v10 = vld [vmem:[%s209_s0 + $0x6] sm:$0x1]  }
   0x6   :  { %13 = vrot.lane.b32.xlu0 %v104_v2, %s135_s16  ;;  %25 = vrot.lane.b32.xlu1 %v106_v3, %s136_s17  ;;  %s141_s7 = smov 56   ;;  %s142_s8 = smov 48   ;;  %v113_v11 = vld [vmem:[%s209_s0 + $0x5] sm:$0x1]   ;;  %v114_v12 = vld [vmem:[%s209_s0 + $0x4] sm:$0x1]  }
   0x7   :  { %s143_s13 = smov 40   ;;  %s144_s14 = smov 32   ;;  %v115_v13 = vld [vmem:[%s209_s0 + $0x3] sm:$0x1]   ;;  %v116_v14 = vld [vmem:[%s209_s0 + $0x2] sm:$0x1]  }
   0x8   :  { %s145_s19 = smov 24   ;;  %s146_s20 = smov 16   ;;  %v117_v15 = vld [vmem:[%s209_s0 + $0x1] sm:$0x1]   ;;  %vm27_vm4 = vcmask 851712   ;;  %vm33_vm5 = vcmask 786112  }
   0x9   :  { %s147_s0 = smov 8   ;;  %vm39_vm6 = vcmask 720512   ;;  %vm45_vm7 = vcmask 654912   ;;  %vm51_vm8 = vcmask 589312   ;;  %vm57_vm9 = vcmask 523712  }
   0xa   :  { %31 = vrot.lane.b32.xlu0 %v107_v4, %s137_s24  ;;  %37 = vrot.lane.b32.xlu1 %v108_v5, %s138_s25  ;;  %vm63_vm10 = vcmask 458112   ;;  %vm69_vm11 = vcmask 392512   ;;  %vm75_vm12 = vcmask 326912   ;;  %vm81_vm13 = vcmask 261312  }
   0xb   :  { %vm87_vm14 = vcmask 195712   ;;  %vm93_vm15 = vcmask 130112  }
   0xe   :  { %43 = vrot.lane.b32.xlu0 %v109_v7, %s139_s30  ;;  %49 = vrot.lane.b32.xlu1 %v110_v8, %s140_s2 }
  0x12   :  { %55 = vrot.lane.b32.xlu0 %v111_v9, %s141_s7  ;;  %61 = vrot.lane.b32.xlu1 %v112_v10, %s142_s8 }
  0x16   :  { %67 = vrot.lane.b32.xlu0 %v113_v11, %s143_s13  ;;  %73 = vrot.lane.b32.xlu1 %v114_v12, %s144_s14 }
  0x1a   :  { %79 = vrot.lane.b32.xlu0 %v115_v13, %s145_s19  ;;  %85 = vrot.lane.b32.xlu1 %v116_v14, %s146_s20 }
  0x1e   :  { %91 = vrot.lane.b32.xlu0 %v117_v15, %s147_s0 }
  0x74   :  { %v8_v16 = vpop.permute.xlu0 %7   ;;  %v20_v17 = vpop.permute.xlu1 %19  }
  0x75   :  { %10 = vst.msk [vmem:[#allocation0] sm:$0x1] %vm9_vm1, %v8_v16  }
  0x78   :  { %v14_v18 = vpop.permute.xlu0 %13   ;;  %v26_v19 = vpop.permute.xlu1 %25  }
  0x79   :  { %16 = vst.msk [vmem:[#allocation0] sm:$0x1] %vm15_vm2, %v14_v18  }
  0x7a   :  { %22 = vst.msk [vmem:[#allocation0] sm:$0x1] %vm21_vm3, %v20_v17  }
  0x7b   :  { %28 = vst.msk [vmem:[#allocation0] sm:$0x1] %vm27_vm4, %v26_v19  }
  0x7c   :  { %v32_v20 = vpop.permute.xlu0 %31   ;;  %v38_v21 = vpop.permute.xlu1 %37  }
  0x7d   :  { %34 = vst.msk [vmem:[#allocation0] sm:$0x1] %vm33_vm5, %v32_v20  }
  0x7e   :  { %40 = vst.msk [vmem:[#allocation0] sm:$0x1] %vm39_vm6, %v38_v21  }
  0x80   :  { %v44_v22 = vpop.permute.xlu0 %43   ;;  %v50_v23 = vpop.permute.xlu1 %49  }
  0x81   :  { %46 = vst.msk [vmem:[#allocation0] sm:$0x1] %vm45_vm7, %v44_v22  }
  0x82   :  { %52 = vst.msk [vmem:[#allocation0] sm:$0x1] %vm51_vm8, %v50_v23  }
  0x84   :  { %v56_v24 = vpop.permute.xlu0 %55   ;;  %v62_v25 = vpop.permute.xlu1 %61  }
  0x85   :  { %58 = vst.msk [vmem:[#allocation0] sm:$0x1] %vm57_vm9, %v56_v24  }
  0x86   :  { %64 = vst.msk [vmem:[#allocation0] sm:$0x1] %vm63_vm10, %v62_v25  }
  0x88   :  { %v68_v26 = vpop.permute.xlu0 %67   ;;  %v74_v27 = vpop.permute.xlu1 %73  }
  0x89   :  { %70 = vst.msk [vmem:[#allocation0] sm:$0x1] %vm69_vm11, %v68_v26  }
  0x8a   :  { %76 = vst.msk [vmem:[#allocation0] sm:$0x1] %vm75_vm12, %v74_v27  }
  0x8c   :  { %v80_v28 = vpop.permute.xlu0 %79   ;;  %v86_v29 = vpop.permute.xlu1 %85  }
  0x8d   :  { %82 = vst.msk [vmem:[#allocation0] sm:$0x1] %vm81_vm13, %v80_v28  }
  0x8e   :  { %88 = vst.msk [vmem:[#allocation0] sm:$0x1] %vm87_vm14, %v86_v29  }
  0x90   :  { %v92_v30 = vpop.permute.xlu0 %91  }
  0x91   :  { %94 = vst.msk [vmem:[#allocation0] sm:$0x1] %vm93_vm15, %v92_v30  }
  0x98   :  { %v99_v31 = vld [vmem:[#allocation0] sm:$0x1] }
  0x99   :  { %102 = vst [vmem:[%s210_s1] sm:$0x1] %v99_v31 }

// kernel: tile.23
= control target key start
LH: loop header
LB: loop body
LE: loop exit
PB: predicated region body
PF: predicated region fallthrough
CT: control target
= control target key end

     0   :  { %s22_s0 = inlined_call_operand.vmem [shape: f32[16], index: 0, kind: input, shape index: {}]   ;;  %s23_s1 = inlined_call_operand.vmem [shape: f32[8,16], index: 1, kind: output, shape index: {}]  }
   0x1   :  { %v4_v0 = vld [vmem:[%s22_s0] ss:$0 sm:$0xff] }
   0x2   :  { %5 = vst [vmem:[%s23_s1] sm:$0xff] %v4_v0 }

// kernel: tile.24
= control target key start
LH: loop header
LB: loop body
LE: loop exit
PB: predicated region body
PF: predicated region fallthrough
CT: control target
= control target key end

     0   :  { %s69_s10 = smov 112   ;;  %s70_s11 = smov 80   ;;  %vm3_vm0 = vcmask 130048   ;;  %vm9_vm1 = vcmask 1048448   ;;  %vm15_vm2 = vcmask 917248   ;;  %vm21_vm3 = vcmask 786048   ;;  %s113_s0 = inlined_call_operand.vmem [shape: f32[8,16], index: 0, kind: input, shape index: {}]   ;;  %s114_s1 = inlined_call_operand.vmem [shape: f32[1,128], index: 1, kind: output, shape index: {}]  }
   0x1   :  { %v55_v0 = vld [vmem:[%s113_s0 + $0x7] sm:$0x1]   ;;  %v57_v1 = vld [vmem:[%s113_s0 + $0x5] sm:$0x1]   ;;  %v56_v2 = vld [vmem:[%s113_s0 + $0x6] sm:$0x1]  }
   0x2   :  { %7 = vrot.lane.b32.xlu0 %v55_v0, %s69_s10  ;;  %19 = vrot.lane.b32.xlu1 %v57_v1, %s70_s11  ;;  %v58_v3 = vld [vmem:[%s113_s0 + $0x4] sm:$0x1]   ;;  %v2_v4 = vld [vmem:[%s113_s0] sm:$0x1]   ;;  %s71_s18 = smov 96   ;;  %s72_s19 = smov 64  }
   0x3   :  { %4 = vst.msk [vmem:[#allocation0] sm:$0x1] %vm3_vm0, %v2_v4   ;;  %v59_v5 = vld [vmem:[%s113_s0 + $0x3] sm:$0x1]   ;;  %v60_v6 = vld [vmem:[%s113_s0 + $0x2] sm:$0x1]  }
   0x4   :  { %s73_s24 = smov 48   ;;  %s74_s25 = smov 32   ;;  %v61_v7 = vld [vmem:[%s113_s0 + $0x1] sm:$0x1]   ;;  %vm27_vm4 = vcmask 654848   ;;  %vm33_vm5 = vcmask 523648  }
   0x5   :  { %s75_s0 = smov 16   ;;  %vm39_vm6 = vcmask 392448   ;;  %vm45_vm7 = vcmask 261248  }
   0x6   :  { %13 = vrot.lane.b32.xlu0 %v56_v2, %s71_s18  ;;  %25 = vrot.lane.b32.xlu1 %v58_v3, %s72_s19 }
   0xa   :  { %31 = vrot.lane.b32.xlu0 %v59_v5, %s73_s24  ;;  %37 = vrot.lane.b32.xlu1 %v60_v6, %s74_s25 }
   0xe   :  { %43 = vrot.lane.b32.xlu0 %v61_v7, %s75_s0 }
  0x74   :  { %v8_v8 = vpop.permute.xlu0 %7   ;;  %v20_v9 = vpop.permute.xlu1 %19  }
  0x75   :  { %10 = vst.msk [vmem:[#allocation0] sm:$0x1] %vm9_vm1, %v8_v8  }
  0x78   :  { %v14_v10 = vpop.permute.xlu0 %13   ;;  %v26_v11 = vpop.permute.xlu1 %25  }
  0x79   :  { %16 = vst.msk [vmem:[#allocation0] sm:$0x1] %vm15_vm2, %v14_v10  }
  0x7a   :  { %22 = vst.msk [vmem:[#allocation0] sm:$0x1] %vm21_vm3, %v20_v9  }
  0x7b   :  { %28 = vst.msk [vmem:[#allocation0] sm:$0x1] %vm27_vm4, %v26_v11  }
  0x7c   :  { %v32_v12 = vpop.permute.xlu0 %31   ;;  %v38_v13 = vpop.permute.xlu1 %37  }
  0x7d   :  { %34 = vst.msk [vmem:[#allocation0] sm:$0x1] %vm33_vm5, %v32_v12  }
  0x7e   :  { %40 = vst.msk [vmem:[#allocation0] sm:$0x1] %vm39_vm6, %v38_v13  }
  0x80   :  { %v44_v14 = vpop.permute.xlu0 %43  }
  0x81   :  { %46 = vst.msk [vmem:[#allocation0] sm:$0x1] %vm45_vm7, %v44_v14  }
  0x88   :  { %v51_v15 = vld [vmem:[#allocation0] sm:$0x1] }
  0x89   :  { %54 = vst [vmem:[%s114_s1] sm:$0x1] %v51_v15 }

// kernel: divit_forward.1
= control target key start
LH: loop header
LB: loop body
LE: loop exit
PB: predicated region body
PF: predicated region fallthrough
CT: control target
= control target key end

     0   :  { %14 = vsyncpa [#allocation3], 0  ;;  %s2188_s0 = inlined_call_operand.vmem [shape: bf16[8,2,9,54], index: 0, kind: input, shape index: {}]   ;;  %s2189_s1 = inlined_call_operand.vmem [shape: bf16[162,128], index: 1, kind: input, shape index: {}]   ;;  %s2190_s2 = inlined_call_operand.vmem [shape: f32[1,128], index: 2, kind: input, shape index: {}]   ;;  %s2191_s3 = inlined_call_operand.vmem [shape: bf16[384,128], index: 3, kind: input, shape index: {}]   ;;  %s2192_s4 = inlined_call_operand.vmem [shape: f32[1,128], index: 4, kind: input, shape index: {}]   ;;  %s2193_s5 = inlined_call_operand.vmem [shape: f32[128,5], index: 5, kind: input, shape index: {}]   ;;  %s2194_s6 = inlined_call_operand.vmem [shape: f32[1,5], index: 6, kind: input, shape index: {}]   ;;  %s2195_s7 = inlined_call_operand.vmem [shape: f32[8,8,128], index: 7, kind: output, shape index: {0}]   ;;  %s2196_s8 = inlined_call_operand.hbm [shape: f32[2,4,5], index: 8, kind: output, shape index: {1}]  }
   0x1   :  { %16 = vsyncpa [#allocation3 + $0x1], 0  ;;  %s1803_s27 = smov 0   ;;  %s1805_s28 = smov 0  }
   0x2   :  { %s1807_s29 = smov 0   ;;  %s1809_s30 = smov 0  }
   0x3 LB: > { %s1824_s9 = sadd.s32 4294967295, %s1750_s30   ;;  %s1394_s10 = sadd.s32 4294967294, %s1750_s30   ;;  %s1750_s30 = sphi %s1809_s30, %s2204_s30   ;;  %s1746_s29 = sphi %s1807_s29, %s2203_s29   ;;  %s1742_s28 = sphi %s1805_s28, %s2202_s28   ;;  %s1738_s27 = sphi %s1803_s27, %s2201_s27  }
   0x4   : > { %s1828_s11 = sadd.s32 1, %s1750_s30   ;;  %s207_s12 = sadd.s32 1, %s1746_s29 }
   0x5   : > { %s204_s13 = ssub.s32 %s1750_s30, %s1828_s11  ;;  %p217_p0 = scmp.ne.s32.totalorder %s1746_s29, %s1742_s28 }
   0x6   : > { %p205_p1 = scmp.eq.s32.totalorder %s204_s13, 0  ;;  %p218_p2 = scmp.eq.s32.totalorder %s1824_s9, 1 }
   0x7   : > { %p223_p3 = scmp.ne.s32.totalorder %s1742_s28, %s1738_s27  ;;  %p224_p4 = scmp.eq.s32.totalorder %s1394_s10, 1 }
   0x8   : > { %s1839_s14 = scalar_select %p205_p1, %s1746_s29, %s207_s12  }
   0x9   : > { %p1841_p5 = por %p218_p2, %p217_p0  ;;  %p1845_p6 = por %p224_p4, %p223_p3 }
   0xa   : > { %p1397_p7 = scmp.ge.s32.totalorder %s1750_s30, 1  ;;  %p270_p8 = scmp.lt.s32.totalorder %s1750_s30, 3 }
   0xc   : > { %p271_p9 = pnand %p1397_p7, %p270_p8 }
   0xd   : > { %s1399_s17 = sshll.u32 (!%p271_p9), %s1824_s9, 2  ;;  %s1753_s18 = smov (!%p271_p9), 54  }
   0xe   : > { %274 = sbr.rel (%p271_p9) target bundleno = 806 (0x326), region = 48  ;;  %p311_p10 = scmp.lt.s32.totalorder (!%p271_p9), %s1399_s17, 7 }
   0xf   : > { %s1754_s21 = smov (!%p271_p9), 108   ;;  %s1481_s20 = sshll.u32 (!%p271_p9), %s1824_s9, 6 }
  0x10   : > { %s1757_s9 = smov (!%p271_p9), [#allocation2]  }
  0x13   : > { %v1655_v0 = vld [vmem:[%s2189_s1 + $0x38] sm:$0xff]   ;;  %v1752_v1 = vmov 0   ;;  %v1656_v2 = vld [vmem:[%s2189_s1 + $0x30] sm:$0xff]   ;;  %s2206_s17 = smov (!%p311_p10, %s1399_s17), 7  ;;  %v1657_v3 = vld [vmem:[%s2189_s1 + $0x28] sm:$0xff]   ;;  %vm591_vm0 = vcmask 1040384  }
  0x14   : > { %595 = vmatprep.subr.bf16.mxu0 %v1752_v1  ;;  %720 = vmatprep.subr.bf16.mxu1 %v1752_v1  ;;  %s1484_s22 = sshll.u32 %s2206_s17, 4  ;;  %v1658_v13 = vld [vmem:[%s2189_s1 + $0x20] sm:$0xff]   ;;  %v1659_v30 = vld [vmem:[%s2189_s1 + $0x18] sm:$0xff]   ;;  %v1660_v48 = vld [vmem:[%s2189_s1 + $0x10] sm:$0xff]   ;;  %vm453_vm1 = vcmask 441344   ;;  %vm466_vm2 = vcmask 883712  }
  0x15   : > { %596 = vmatpush1.bf16.msra.mxu0 %v1655_v0  ;;  %721 = vmatpush1.bf16.msra.mxu1 %v1655_v0  ;;  %s1868_s25 = scalar_lea.vmem %s2188_s0, %s1484_s22  ;;  %v1661_v55 = vld [vmem:[%s2189_s1 + $0x8] sm:$0xff]   ;;  %v1662_v58 = vld [vmem:[%s2189_s1] sm:$0xff]   ;;  %v1663_v59 = vld [vmem:[%s2189_s1 + $0x50] ss:$0 sps:$4 sm:$0x11]   ;;  %vm584_vm3 = vcmask 277504  }
  0x16   : > { %597 = vmatprep.subr.bf16.mxu0 %v1752_v1  ;;  %722 = vmatprep.subr.bf16.mxu1 %v1752_v1  ;;  %v1874_v4 = vld [vmem:[%s1868_s25 + $0x18] sm:$0xf]  ;;  %v1409_v5 = vld [vmem:[%s1868_s25 + $0x1c] sm:$0x1]  ;;  %v1878_v6 = vld [vmem:[%s1868_s25 + $0x8] sm:$0xf] }
  0x17   : > { %v1439_v7 = vcombine.low %v1874_v4, %v1874_v4  ;;  %v1417_v8 = vcombine.low %v1874_v4, %v1409_v5  ;;  %v1408_v9 = vld [vmem:[%s1868_s25 + $0xc] sm:$0x1]  ;;  %v1438_v10 = vcombine.low %v1878_v6, %v1878_v6  ;;  %v1647_v12 = vld [vmem:[%s1868_s25] sm:$0x1f]   ;;  %v1648_v14 = vld [vmem:[%s1868_s25 + $0x10] sm:$0x1f]  }
  0x18   : > { %v1416_v11 = vcombine.low %v1878_v6, %v1408_v9  ;;  %v362_v16 = vshrl.u32 %v1647_v12, 16  ;;  %v364_v17 = vshll.u32 %v1647_v12, 16  ;;  %v369_v20 = vshrl.u32 %v1648_v14, 16  ;;  %v1649_v24 = vld [vmem:[%s1868_s25 + $0x20] sm:$0x1f]   ;;  %v1664_v63 = vld [vmem:[%s2189_s1 + $0x48] sm:$0xff]  }
  0x19   : > { %598 = vmatpush1.bf16.msra.mxu0 %v1656_v2  ;;  %723 = vmatpush1.bf16.msra.mxu1 %v1656_v2  ;;  %v427_v15 = vshll.u32 %v1417_v8, 16  ;;  %v371_v21 = vshll.u32 %v1648_v14, 16  ;;  %v425_v22 = vshrl.u32 %v1417_v8, 16  ;;  %v378_v28 = vshll.u32 %v1649_v24, 16  ;;  %v1650_v29 = vld [vmem:[%s1868_s25 + $0x30] sm:$0x1f]  }
  0x1a   : > { %599 = vmatprep.subr.bf16.mxu0 %v1752_v1  ;;  %724 = vmatprep.subr.bf16.mxu1 %v1752_v1  ;;  %v418_v18 = vshrl.u32 %v1416_v11, 16  ;;  %v420_v19 = vshll.u32 %v1416_v11, 16  ;;  %v366_v25 = vrot.slane %v364_v17, 1  ;;  %v1904_v33 = vld [vmem:[%s1868_s25 + $0x28] sm:$0xf]  ;;  %v376_v38 = vshrl.u32 %v1649_v24, 16 }
  0x1b   : > { %662 = vrot.lane.b32.xlu1 %v1439_v7, %s1753_s18  ;;  %660 = vrot.lane.b32.xlu0 %v1438_v10, %s1753_s18  ;;  %v429_v23 = vrot.slane %v427_v15, 1  ;;  %v373_v27 = vrot.slane %v371_v21, 1  ;;  %v1410_v34 = vld [vmem:[%s1868_s25 + $0x2c] sm:$0x1]  ;;  %v1908_v35 = vld [vmem:[%s1868_s25 + $0x38] sm:$0xf]  ;;  %v1440_v61 = vcombine.low %v1904_v33, %v1904_v33 }
  0x1c   : > { %v422_v26 = vrot.slane %v420_v19, 1  ;;  %v367_v31 = vor.u32 %v366_v25, %v362_v16  ;;  %v385_v39 = vshll.u32 %v1650_v29, 16  ;;  %v1411_v40 = vld [vmem:[%s1868_s25 + $0x3c] sm:$0x1]  ;;  %v380_v41 = vrot.slane %v378_v28, 1  ;;  %v1665_v0 = vld [vmem:[%s2189_s1 + $0x40] sm:$0xff]  }
  0x1d   : > { %600 = vmatpush1.bf16.msra.mxu0 %v1657_v3  ;;  %725 = vmatpush1.bf16.msra.mxu1 %v1657_v3  ;;  %v374_v36 = vor.u32 %v373_v27, %v369_v20  ;;  %v430_v37 = vor.u32 %v429_v23, %v425_v22  ;;  %v383_v42 = vshrl.u32 %v1650_v29, 16  ;;  %v1418_v43 = vcombine.low %v1904_v33, %v1410_v34  ;;  %v1963_v2 = vld [vmem:[%s2191_s3 + $0xb8] sm:$0xff]   ;;  %v1672_v19 = vld [vmem:[%s2191_s3 + $0x30] sm:$0xff]   ;;  %v1673_v20 = vld [vmem:[%s2191_s3 + $0x68] sm:$0xff]   ;;  %s1403_s10 = sshll.u32 %s2206_s17, 3  ;;  %s307_s17 = sand.u32 1, %s1742_s28  }
  0x1e   : > { %601 = vmatprep.subr.bf16.mxu0 %v1752_v1  ;;  %726 = vmatprep.subr.bf16.mxu1 %v1752_v1  ;;  %v423_v32 = vor.u32 %v422_v26, %v418_v18  ;;  %v1419_v44 = vcombine.low %v1908_v35, %v1411_v40  ;;  %v387_v45 = vrot.slane %v385_v39, 1  ;;  %v381_v51 = vor.u32 %v380_v41, %v376_v38  ;;  %v1667_v3 = vld [vmem:[%s2191_s3 + $0x78] sm:$0xff]   ;;  %v653_v25 = vld [vmem:[%s1868_s25 + $0x10] sm:$0xf]  ;;  %v652_v26 = vld [vmem:[%s1868_s25] sm:$0xf] }
  0x1f   : > { %389 = vrot.lane.b32.xlu0 %v367_v31, %s1753_s18  ;;  %v434_v46 = vshll.u32 %v1418_v43, 16  ;;  %v432_v49 = vshrl.u32 %v1418_v43, 16  ;;  %v593_v60 = vsel %vm591_vm0, %v1663_v59, 0  ;;  %v1441_v62 = vcombine.low %v1908_v35, %v1908_v35  ;;  %v1669_v16 = vld [vmem:[%s2191_s3 + $0x38] sm:$0xff]   ;;  %v1668_v39 = vld [vmem:[%s2191_s3 + $0xb0] sm:$0xff]   ;;  %s1293_s12 = scalar_lea.sflag [#allocation3], %s307_s17 }
  0x20   : > { %445 = vrot.lane.b32.xlu1 %v423_v32, %s1754_s21  ;;  %v441_v47 = vshll.u32 %v1419_v44, 16  ;;  %v439_v50 = vshrl.u32 %v1419_v44, 16  ;;  %v388_v52 = vor.u32 %v387_v45, %v383_v42  ;;  %v654_v42 = vld [vmem:[%s1868_s25 + $0x20] sm:$0xf]  ;;  %v655_v43 = vld [vmem:[%s1868_s25 + $0x30] sm:$0xf] }
  0x21   : > { %602 = vmatpush1.bf16.msra.mxu0 %v1658_v13  ;;  %727 = vmatpush1.bf16.msra.mxu1 %v1658_v13  ;;  %v436_v53 = vrot.slane %v434_v46, 1  ;;  %v1671_v44 = vld [vmem:[%s2191_s3 + $0xa8] sm:$0xff]   ;;  %v1679_v59 = vld [vmem:[%s2191_s3 + $0x58] sm:$0xff]   ;;  %vm810_vm4 = vsmask.f32 256  ;;  %vm1756_vm6 = vmmov 0  }
  0x22   : > { %603 = vmatprep.subr.bf16.mxu0 %v1752_v1  ;;  %728 = vmatprep.subr.bf16.mxu1 %v1752_v1  ;;  %v443_v54 = vrot.slane %v441_v47, 1  ;;  %vm2072_vm5 = vmand %vm591_vm0, %vm810_vm4  ;;  %vm1208_vm7 = vcmask 1041409   ;;  %vm1210_vm8 = vcmask 1042434   ;;  %vm1212_vm9 = vcmask 1043459   ;;  %s1398_s25 = sshll.u32 %s307_s17, 2 }
  0x23   : > { %391 = vrot.lane.b32.xlu0 %v374_v36, %s1753_s18  ;;  %v437_v56 = vor.u32 %v436_v53, %v432_v49  ;;  %v1674_v53 = vld [vmem:[%s2191_s3 + $0xa0] sm:$0xff]   ;;  %s309_s22 = scalar_lea.vmem [#allocation2], %s1398_s25  ;;  %vm1285_vm10 = vcmask 35840  }
  0x24   : > { %447 = vrot.lane.b32.xlu1 %v430_v37, %s1754_s21  ;;  %v444_v57 = vor.u32 %v443_v54, %v439_v50  ;;  %v1675_v54 = vld [vmem:[%s2191_s3 + $0x28] sm:$0xff]   ;;  %s1310_s23 = sshll.u32 %s309_s22, 4  ;;  %s1311_s23 = int_to_ptr.vmem [resolvable:$true] %s1310_s23 }
  0x25   : > { %604 = vmatpush1.bf16.msra.mxu0 %v1659_v30  ;;  %729 = vmatpush1.bf16.msra.mxu1 %v1659_v30  ;;  %s1690_s13 = scalar_lea.vmem %s1311_s23, 64 }
  0x26   : > { %605 = vmatprep.subr.bf16.mxu0 %v1752_v1  ;;  %730 = vmatprep.subr.bf16.mxu1 %v1752_v1  ;;  %p1691_p11 = scmp.ne.s32.totalorder %s1311_s23, %s1690_s13 }
  0x27   : > { %393 = vrot.lane.b32.xlu0 %v381_v51, %s1753_s18 }
  0x28   : > { %395 = vrot.lane.b32.xlu1 %v388_v52, %s1753_s18  ;;  %p1692_p12 = pnand %p1691_p11, %p1841_p5 }
  0x29   : > { %606 = vmatpush1.bf16.msra.mxu0 %v1660_v48  ;;  %731 = vmatpush1.bf16.msra.mxu1 %v1660_v48 }
  0x2a   : > { %607 = vmatprep.subr.bf16.mxu0 %v1752_v1  ;;  %732 = vmatprep.subr.bf16.mxu1 %v1752_v1  ;;  %p1693_p13 = pneg %p1692_p12 }
  0x2b   : > { %449 = vrot.lane.b32.xlu0 %v437_v56, %s1754_s21  ;;  %v1676_v56 = vld [vmem:[%s2191_s3 + $0x60] sm:$0xff]  }
  0x2c   : > { %451 = vrot.lane.b32.xlu1 %v444_v57, %s1754_s21  ;;  %v1678_v57 = vld [vmem:[%s2191_s3 + $0x20] sm:$0xff]  }
  0x2d   : > { %608 = vmatpush1.bf16.msra.mxu0 %v1661_v55  ;;  %733 = vmatpush1.bf16.msra.mxu1 %v1661_v55  ;;  %v1677_v55 = vld [vmem:[%s2191_s3 + $0x98] sm:$0xff]  }
  0x2e   : > { %609 = vmatprep.subr.bf16.mxu0 %v1752_v1  ;;  %734 = vmatprep.subr.bf16.mxu1 %v1752_v1 }
  0x2f   : > { %668 = vrot.lane.b32.xlu0 %v367_v31, %s1754_s21 }
  0x30   : > { %670 = vrot.lane.b32.xlu1 %v374_v36, %s1754_s21 }
  0x31   : > { %610 = vmatpush1.bf16.msra.mxu0 %v1662_v58  ;;  %735 = vmatpush1.bf16.msra.mxu1 %v1662_v58  ;;  %v1680_v58 = vld [vmem:[%s2191_s3 + $0x90] sm:$0xff]  }
  0x32   : > { %621 = vmatprep.subr.bf16.mxu0 %v1752_v1  ;;  %746 = vmatprep.subr.bf16.mxu1 %v1752_v1 }
  0x33   : > { %664 = vrot.lane.b32.xlu0 %v1440_v61, %s1753_s18  ;;  %v1683_v61 = vld [vmem:[%s2191_s3 + $0x88] sm:$0xff]  }
  0x34   : > { %666 = vrot.lane.b32.xlu1 %v1441_v62, %s1753_s18  ;;  %v1682_v62 = vld [vmem:[%s2191_s3 + $0x50] sm:$0xff]   ;;  %s2139_s18 = scalar_lea.vmem %s2195_s7, %s1403_s10  ;;  %s2153_s10 = scalar_lea.hbm %s2196_s8, %s1481_s20 }
  0x35   : > { %622 = vmatpush2.bf16.msra.mxu0 %v593_v60  ;;  %747 = vmatpush2.bf16.msra.mxu1 %v593_v60  ;;  %v1681_v60 = vld [vmem:[%s2191_s3 + $0x18] sm:$0xff]  }
  0x36   : > { %623 = vmatprep.subr.bf16.mxu0 %v1752_v1  ;;  %748 = vmatprep.subr.bf16.mxu1 %v1752_v1 }
  0x37   : > { %672 = vrot.lane.b32.xlu0 %v381_v51, %s1754_s21 }
  0x38   : > { %674 = vrot.lane.b32.xlu1 %v388_v52, %s1754_s21 }
  0x39   : > { %624 = vmatpush2.bf16.msra.mxu0 %v1664_v63  ;;  %749 = vmatpush2.bf16.msra.mxu1 %v1664_v63  ;;  %v1684_v63 = vld [vmem:[%s2191_s3 + $0x10] sm:$0xff]  }
  0x3a   : > { %625 = vmatprep.subr.bf16.mxu0 %v1752_v1  ;;  %750 = vmatprep.subr.bf16.mxu1 %v1752_v1 }
  0x3d   : > { %626 = vmatpush2.bf16.msra.mxu0 %v1665_v0  ;;  %751 = vmatpush2.bf16.msra.mxu1 %v1665_v0  ;;  %v1686_v0 = vld [vmem:[%s2191_s3 + $0x80] sm:$0xff]  }
  0x3e   : > { %1544 = vmatprep.subr.bf16.mxu1 %v1963_v2  ;;  %1489 = vmatprep.subr.bf16.mxu0 %v1667_v3  ;;  %v1687_v3 = vld [vmem:[%s2191_s3 + $0x8] sm:$0xff]  }
  0x8d   : > { %v663_v5 = vpop.permute.xlu1 %662  ;;  %v661_v7 = vpop.permute.xlu0 %660 }
  0x8e   : > { %v681_v31 = vsel %vm453_vm1, %v653_v25, %v663_v5  ;;  %v678_v32 = vsel %vm453_vm1, %v652_v26, %v661_v7  ;;  %v1688_v5 = vld [vmem:[%s2191_s3 + $0x40] sm:$0xff]  }
  0x8f   : > { %v1689_v7 = vld [vmem:[%s2191_s3] sm:$0xff]  }
  0x91   : > { %v390_v8 = vpop.permute.xlu0 %389 }
  0x92   : > { %v446_v9 = vpop.permute.xlu1 %445  ;;  %v456_v10 = vsel %vm453_vm1, %v1878_v6, %v390_v8  ;;  %v1670_v6 = vld [vmem:[%s2191_s3 + $0x70] sm:$0xff]   ;;  %v1420_v8 = vld [vmem:[%s2190_s2] ss:$0 sm:$0xff] }
  0x93   : > { %v468_v14 = vsel %vm466_vm2, %v456_v10, %v446_v9 }
  0x95   : > { %v392_v11 = vpop.permute.xlu0 %391 }
  0x96   : > { %v448_v1 = vpop.permute.xlu1 %447  ;;  %v459_v12 = vsel %vm453_vm1, %v1874_v4, %v392_v11 }
  0x97   : > { %v1422_v13 = vcombine.low %v446_v9, %v448_v1  ;;  %v470_v15 = vsel %vm466_vm2, %v459_v12, %v448_v1 }
  0x98   : > { %v1421_v17 = vcombine.low %v468_v14, %v470_v15 }
  0x99   : > { %1436 = vmatprep.mubr.msk.bf16.mxu0 %vm584_vm3, %v1422_v13  ;;  %v394_v18 = vpop.permute.xlu0 %393 }
  0x9a   : > { %v396_v4 = vpop.permute.xlu1 %395  ;;  %628 = vmatmul.mubr.bf16.vlgmr.msra.gmra.mxu0 %v1421_v17  ;;  %v462_v21 = vsel %vm453_vm1, %v1904_v33, %v394_v18 }
  0x9b   : > { %1490 = vmatpush3.bf16.msra.mxu0 %v1669_v16  ;;  %v465_v22 = vsel %vm453_vm1, %v1908_v35, %v396_v4 }
  0x9c   : > { %1491 = vmatprep.subr.bf16.mxu0 %v1670_v6 }
  0x9d   : > { %v450_v23 = vpop.permute.xlu0 %449 }
  0x9e   : > { %v452_v24 = vpop.permute.xlu1 %451  ;;  %v472_v27 = vsel %vm466_vm2, %v462_v21, %v450_v23 }
  0x9f   : > { %v474_v28 = vsel %vm466_vm2, %v465_v22, %v452_v24  ;;  %v1424_v29 = vcombine.low %v450_v23, %v452_v24  ;;  %1492 = vmatpush3.bf16.msra.mxu0 %v1672_v19 }
  0xa0   : > { %v1423_v30 = vcombine.low %v472_v27, %v474_v28  ;;  %1493 = vmatprep.subr.bf16.mxu0 %v1673_v20 }
  0xa1   : > { %1437 = vmatprep.mubr.msk.bf16.mxu0 %vm584_vm3, %v1424_v29  ;;  %v669_v33 = vpop.permute.xlu0 %668 }
  0xa2   : > { %v671_v34 = vpop.permute.xlu1 %670  ;;  %v689_v35 = vsel %vm466_vm2, %v678_v32, %v669_v33  ;;  %636 = vmatmul.mubr.bf16.gmra.mxu0 %v1423_v30 }
  0xa3   : > { %v691_v36 = vsel %vm466_vm2, %v681_v31, %v671_v34  ;;  %v1443_v37 = vcombine.low %v669_v33, %v671_v34  ;;  %1494 = vmatpush3.bf16.msra.mxu0 %v1675_v54 }
  0xa4   : > { %v1442_v38 = vcombine.low %v689_v35, %v691_v36  ;;  %1495 = vmatprep.subr.bf16.mxu0 %v1676_v56 }
  0xa5   : > { %1446 = vmatprep.mubr.msk.bf16.mxu1 %vm584_vm3, %v1443_v37  ;;  %v665_v40 = vpop.permute.xlu0 %664 }
  0xa6   : > { %753 = vmatmul.mubr.bf16.vlgmr.msra.gmra.mxu1 %v1442_v38  ;;  %v667_v41 = vpop.permute.xlu1 %666  ;;  %v684_v45 = vsel %vm453_vm1, %v654_v42, %v665_v40 }
  0xa7   : > { %1545 = vmatpush3.bf16.msra.mxu1 %v1963_v2  ;;  %v687_v46 = vsel %vm453_vm1, %v655_v43, %v667_v41  ;;  %1496 = vmatpush3.bf16.msra.mxu0 %v1678_v57  ;;  %v1685_v2 = vld [vmem:[%s2191_s3 + $0x48] sm:$0xff]  }
  0xa8   : > { %1546 = vmatprep.subr.bf16.mxu1 %v1668_v39  ;;  %1497 = vmatprep.subr.bf16.mxu0 %v1679_v59 }
  0xa9   : > { %v673_v47 = vpop.permute.xlu0 %672 }
  0xaa   : > { %v675_v48 = vpop.permute.xlu1 %674  ;;  %v693_v49 = vsel %vm466_vm2, %v684_v45, %v673_v47 }
  0xab   : > { %v695_v50 = vsel %vm466_vm2, %v687_v46, %v675_v48  ;;  %v1445_v51 = vcombine.low %v673_v47, %v675_v48  ;;  %1547 = vmatpush3.bf16.msra.mxu1 %v1668_v39  ;;  %1498 = vmatpush3.bf16.msra.mxu0 %v1681_v60 }
  0xac   : > { %v1444_v52 = vcombine.low %v693_v49, %v695_v50  ;;  %1548 = vmatprep.subr.bf16.mxu1 %v1671_v44  ;;  %1499 = vmatprep.subr.bf16.mxu0 %v1682_v62 }
  0xad   : > { %1447 = vmatprep.mubr.msk.bf16.mxu1 %vm584_vm3, %v1445_v51 }
  0xae   : > { %761 = vmatmul.mubr.bf16.gmra.mxu1 %v1444_v52 }
  0xaf   : > { %1549 = vmatpush3.bf16.msra.mxu1 %v1671_v44  ;;  %1500 = vmatpush3.bf16.msra.mxu0 %v1684_v63 }
  0xb0   : > { %1550 = vmatprep.subr.bf16.mxu1 %v1674_v53  ;;  %1501 = vmatprep.subr.bf16.mxu0 %v1685_v2 }
  0xb3   : > { %1551 = vmatpush3.bf16.msra.mxu1 %v1674_v53  ;;  %1502 = vmatpush3.bf16.msra.mxu0 %v1687_v3 }
  0xb4   : > { %1552 = vmatprep.subr.bf16.mxu1 %v1677_v55  ;;  %1503 = vmatprep.subr.bf16.mxu0 %v1688_v5 }
  0xb7   : > { %1553 = vmatpush3.bf16.msra.mxu1 %v1677_v55  ;;  %1504 = vmatpush3.bf16.msra.mxu0 %v1689_v7 }
  0xb8   : > { %1554 = vmatprep.subr.bf16.mxu1 %v1680_v58 }
  0xbb   : > { %1555 = vmatpush3.bf16.msra.mxu1 %v1680_v58 }
  0xbc   : > { %1556 = vmatprep.subr.bf16.mxu1 %v1683_v61 }
  0xbf   : > { %1557 = vmatpush3.bf16.msra.mxu1 %v1683_v61 }
  0xc0   : > { %1558 = vmatprep.subr.bf16.mxu1 %v1686_v0 }
  0xc3   : > { %1559 = vmatpush3.bf16.msra.mxu1 %v1686_v0 }
 0x15a   : > { %v629_v9 = vpop.f32.mrf.mxu0 }
 0x15b   : > { %v630_v10 = vadd.f32 %v1420_v8, %v629_v9  ;;  %v1755_v9 = vmov 0.0  }
 0x15c   : > { %v631_v11 = vpop.f32.mrf.mxu0  ;;  %1564 = vmatprep.subr.mxu0 %v1755_v9 }
 0x15d   : > { %v644_v1 = vmax.f32 %v630_v10, 0.0  ;;  %v1195_v10 = vld [vmem:[%s2193_s5 + $0x70] sm:$0xff]  ;;  %v1194_v11 = vld [vmem:[%s2193_s5 + $0x68] sm:$0xff] }
 0x15e   : > { %v632_v12 = vpop.f32.mrf.mxu0 }
 0x15f   : > { %v648_v13 = vpack.c.bf16 %v644_v1, %v644_v1  ;;  %v633_v14 = vadd.f32 %v1420_v8, %v632_v12  ;;  %v1192_v12 = vld [vmem:[%s2193_s5 + $0x58] sm:$0xff] }
 0x160   : > { %v634_v15 = vpop.f32.mrf.mxu0 }
 0x161   : > { %v645_v16 = vmax.f32 %v633_v14, 0.0  ;;  %v778_v17 = vshrl.u32 %v648_v13, 16  ;;  %v781_v31 = vshll.u32 %v648_v13, 16  ;;  %v1191_v13 = vld [vmem:[%s2193_s5 + $0x50] sm:$0xff]  ;;  %v1190_v14 = vld [vmem:[%s2193_s5 + $0x48] sm:$0xff]  ;;  %v1189_v15 = vld [vmem:[%s2193_s5 + $0x40] sm:$0xff] }
 0x162   : > { %v637_v6 = vpop.f32.mrf.mxu0 }
 0x163   : > { %v649_v18 = vpack.c.bf16 %v645_v16, %v645_v16  ;;  %v1486_v4 = vpack.c.bf16 %v645_v16, %v644_v1  ;;  %v638_v19 = vadd.f32 %v1420_v8, %v637_v6  ;;  %v780_v24 = vrot.slane %v778_v17, 7  ;;  %v1193_v1 = vld [vmem:[%s2193_s5 + $0x60] sm:$0xff]  ;;  %v1188_v16 = vld [vmem:[%s2193_s5 + $0x38] sm:$0xff]  ;;  %v1187_v17 = vld [vmem:[%s2193_s5 + $0x30] sm:$0xff] }
 0x164   : > { %v639_v20 = vpop.f32.mrf.mxu0  ;;  %v1186_v6 = vld [vmem:[%s2193_s5 + $0x28] sm:$0xff] }
 0x165   : > { %v785_v21 = vshrl.u32 %v649_v18, 16  ;;  %v646_v22 = vmax.f32 %v638_v19, 0.0  ;;  %1560 = vmatprep.mubr.bf16.mxu1 %v1486_v4  ;;  %v788_v27 = vshll.u32 %v649_v18, 16  ;;  %v783_v37 = vor.u32 %v781_v31, %v780_v24  ;;  %v1185_v18 = vld [vmem:[%s2193_s5 + $0x20] sm:$0xff]  ;;  %v1184_v4 = vld [vmem:[%s2193_s5 + $0x18] sm:$0xff]  ;;  %v1183_v19 = vld [vmem:[%s2193_s5 + $0x10] sm:$0xff] }
 0x166   : > { %v754_v23 = vpop.f32.mrf.mxu1  ;;  %v640_v25 = vpop.f32.mrf.mxu0  ;;  %v1182_v20 = vld [vmem:[%s2193_s5 + $0x8] sm:$0xff] }
 0x167   : > { %v787_v26 = vrot.slane %v785_v21, 7  ;;  %v650_v28 = vpack.c.bf16 %v646_v22, %v646_v22  ;;  %v641_v29 = vadd.f32 %v1420_v8, %v640_v25  ;;  %v755_v32 = vadd.f32 %v1420_v8, %v754_v23  ;;  %v1181_v21 = vld [vmem:[%s2193_s5] sm:$0xff] }
 0x168   : > { %v756_v30 = vpop.f32.mrf.mxu1  ;;  %v642_v33 = vpop.f32.mrf.mxu0  ;;  %v812_v49 = vsel %vm2072_vm5, 0, %v783_v37  ;;  %v1448_v25 = vld [vmem:[%s2192_s4] ss:$0 sm:$0xff] }
 0x169   : > { %v790_v34 = vor.u32 %v788_v27, %v787_v26  ;;  %v647_v35 = vmax.f32 %v641_v29, 0.0  ;;  %v792_v38 = vshrl.u32 %v650_v28, 16  ;;  %v769_v45 = vmax.f32 %v755_v32, 0.0 }
 0x16a   : > { %v757_v36 = vpop.f32.mrf.mxu1  ;;  %v795_v56 = vshll.u32 %v650_v28, 16 }
 0x16b   : > { %v758_v39 = vadd.f32 %v1420_v8, %v757_v36  ;;  %v651_v41 = vpack.c.bf16 %v647_v35, %v647_v35  ;;  %v1488_v42 = vpack.c.bf16 %v647_v35, %v646_v22  ;;  %v813_v44 = vsel %vm2072_vm5, 0, %v790_v34 }
 0x16c   : > { %v759_v43 = vpop.f32.mrf.mxu1  ;;  %v794_v50 = vrot.slane %v792_v38, 7  ;;  %v1449_v52 = vcombine.low %v812_v49, %v813_v44 }
 0x16d   : > { %v770_v46 = vmax.f32 %v758_v39, 0.0  ;;  %v799_v47 = vshrl.u32 %v651_v41, 16  ;;  %1561 = vmatmul.mubr.bf16.vlgmr.msra.gmra.mxu1 %v1488_v42  ;;  %v802_v54 = vshll.u32 %v651_v41, 16 }
 0x16e   : > { %v762_v48 = vpop.f32.mrf.mxu1  ;;  %v797_v61 = vor.u32 %v795_v56, %v794_v50 }
 0x16f   : > { %v1485_v51 = vpack.c.bf16 %v770_v46, %v769_v45  ;;  %v801_v53 = vrot.slane %v799_v47, 7  ;;  %v763_v57 = vadd.f32 %v1420_v8, %v762_v48 }
 0x170   : > { %v764_v55 = vpop.f32.mrf.mxu1  ;;  %v814_v5 = vsel %vm2072_vm5, 0, %v797_v61 }
 0x171   : > { %1083 = vmatprep.mubr.bf16.mxu0 %v1485_v51  ;;  %v804_v59 = vor.u32 %v802_v54, %v801_v53  ;;  %v771_v63 = vmax.f32 %v763_v57, 0.0 }
 0x172   : > { %v765_v58 = vpop.f32.mrf.mxu1  ;;  %1084 = vmatmul.mubr.bf16.vlgmr.msra.gmra.mxu0 %v1449_v52 }
 0x173   : > { %v766_v60 = vadd.f32 %v1420_v8, %v765_v58  ;;  %v815_v2 = vsel %vm2072_vm5, 0, %v804_v59  ;;  %v1196_v8 = vld [vmem:[%s2193_s5 + $0x78] sm:$0xff] }
 0x174   : > { %v767_v62 = vpop.f32.mrf.mxu1  ;;  %v1452_v7 = vcombine.low %v814_v5, %v815_v2  ;;  %1565 = vmatpush3.msra.mxu0 %v1196_v8 }
 0x175   : > { %v772_v0 = vmax.f32 %v766_v60, 0.0  ;;  %1566 = vmatprep.subr.mxu0 %v1755_v9 }
 0x176   : > { %1567 = vmatpush3.msra.mxu0 %v1195_v10 }
 0x177   : > { %v1487_v3 = vpack.c.bf16 %v772_v0, %v771_v63  ;;  %1568 = vmatprep.subr.mxu0 %v1755_v9 }
 0x178   : > { %1569 = vmatpush3.msra.mxu0 %v1194_v11 }
 0x179   : > { %1091 = vmatprep.mubr.bf16.mxu0 %v1487_v3  ;;  %1570 = vmatprep.subr.mxu0 %v1755_v9 }
 0x17a   : > { %1092 = vmatmul.mubr.bf16.gmra.mxu0 %v1452_v7 }
 0x17b   : > { %1571 = vmatpush3.msra.mxu0 %v1193_v1  ;;  %1596 = vmatprep.mubr.msk.f32.mxu0 %vm1756_vm6, %v1755_v9 }
 0x17c   : > { %1572 = vmatprep.subr.mxu0 %v1755_v9 }
 0x17d   : > { %1573 = vmatpush3.msra.mxu0 %v1192_v12 }
 0x17e   : > { %1574 = vmatprep.subr.mxu0 %v1755_v9 }
 0x17f   : > { %1575 = vmatpush3.msra.mxu0 %v1191_v13 }
 0x180   : > { %1576 = vmatprep.subr.mxu0 %v1755_v9 }
 0x181   : > { %1577 = vmatpush3.msra.mxu0 %v1190_v14 }
 0x182   : > { %1578 = vmatprep.subr.mxu0 %v1755_v9 }
 0x183   : > { %1579 = vmatpush3.msra.mxu0 %v1189_v15 }
 0x184   : > { %1580 = vmatprep.subr.mxu0 %v1755_v9 }
 0x185   : > { %1581 = vmatpush3.msra.mxu0 %v1188_v16  ;;  %v1479_v16 = vld [vmem:[%s2194_s6] ss:$0 sm:$0xff] }
 0x186   : > { %1582 = vmatprep.subr.mxu0 %v1755_v9 }
 0x187   : > { %1583 = vmatpush3.msra.mxu0 %v1187_v17 }
 0x188   : > { %1584 = vmatprep.subr.mxu0 %v1755_v9 }
 0x189   : > { %1585 = vmatpush3.msra.mxu0 %v1186_v6 }
 0x18a   : > { %1586 = vmatprep.subr.mxu0 %v1755_v9 }
 0x18b   : > { %1587 = vmatpush3.msra.mxu0 %v1185_v18 }
 0x18c   : > { %1588 = vmatprep.subr.mxu0 %v1755_v9 }
 0x18d   : > { %1589 = vmatpush3.msra.mxu0 %v1184_v4 }
 0x18e   : > { %1590 = vmatprep.subr.mxu0 %v1755_v9 }
 0x18f   : > { %1591 = vmatpush3.msra.mxu0 %v1183_v19 }
 0x190   : > { %1592 = vmatprep.subr.mxu0 %v1755_v9 }
 0x191   : > { %1593 = vmatpush3.msra.mxu0 %v1182_v20 }
 0x192   : > { %1594 = vmatprep.subr.mxu0 %v1755_v9 }
 0x193   : > { %1595 = vmatpush3.msra.mxu0 %v1181_v21 }
 0x22d   : > { %v1562_v22 = vpop.f32.mrf.mxu1 }
 0x22f   : > { %v1134_v24 = vpop.f32.mrf.mxu1 }
 0x231   : > { %v1563_v30 = vpop.f32.mrf.mxu1 }
 0x232   : > { %v1505_v23 = vpop.f32.mrf.mxu0 }
 0x233   : > { %v1137_v37 = vpop.f32.mrf.mxu1 }
 0x234   : > { %v1506_v26 = vpop.f32.mrf.mxu0 }
 0x235   : > { %v1507_v27 = vadd.f32 %v1506_v26, %v1505_v23 }
 0x236   : > { %v1508_v28 = vpop.f32.mrf.mxu0 }
 0x237   : > { %v1086_v29 = vadd.f32 %v1507_v27, %v1448_v25 }
 0x238   : > { %v1509_v31 = vpop.f32.mrf.mxu0 }
 0x239   : > { %v1135_v32 = vadd.f32 %v1134_v24, %v1086_v29  ;;  %v1510_v33 = vadd.f32 %v1509_v31, %v1508_v28 }
 0x23a   : > { %v1511_v34 = vpop.f32.mrf.mxu0 }
 0x23b   : > { %v1149_v35 = vmax.f32 %v1135_v32, 0.0  ;;  %v1089_v36 = vadd.f32 %v1510_v33, %v1448_v25 }
 0x23c   : > { %v1512_v38 = vpop.f32.mrf.mxu0 }
 0x23d   : > { %1153 = vst [vmem:[%s2139_s18] sm:$0xff] %v1149_v35  ;;  %v1157_v39 = vrot.slane %v1149_v35, 4  ;;  %v1138_v40 = vadd.f32 %v1137_v37, %v1089_v36  ;;  %v1513_v41 = vadd.f32 %v1512_v38, %v1511_v34 }
 0x23e   : > { %v1514_v42 = vpop.f32.mrf.mxu0 }
 0x23f   : > { %v1150_v43 = vmax.f32 %v1138_v40, 0.0  ;;  %v1094_v44 = vadd.f32 %v1513_v41, %v1448_v25  ;;  %v1158_v46 = vadd.f32 %v1157_v39, %v1149_v35 }
 0x240   : > { %v1515_v45 = vpop.f32.mrf.mxu0 }
 0x241   : > { %1154 = vst [vmem:[%s2139_s18 + $0x8] sm:$0xff] %v1150_v43  ;;  %v1163_v47 = vrot.slane %v1150_v43, 4  ;;  %v1143_v48 = vadd.f32 %v1562_v22, %v1094_v44  ;;  %v1516_v49 = vadd.f32 %v1515_v45, %v1514_v42  ;;  %v1159_v53 = vrot.slane %v1158_v46, 2 }
 0x243   : > { %v1164_v50 = vadd.f32 %v1163_v47, %v1150_v43  ;;  %v1151_v51 = vmax.f32 %v1143_v48, 0.0  ;;  %v1097_v52 = vadd.f32 %v1516_v49, %v1448_v25  ;;  %v1160_v60 = vadd.f32 %v1159_v53, %v1158_v46 }
 0x245   : > { %v1165_v54 = vrot.slane %v1164_v50, 2  ;;  %1155 = vst [vmem:[%s2139_s18 + $0x10] sm:$0xff] %v1151_v51  ;;  %v1169_v55 = vrot.slane %v1151_v51, 4  ;;  %v1146_v56 = vadd.f32 %v1563_v30, %v1097_v52  ;;  %v1161_v3 = vrot.slane %v1160_v60, 1 }
 0x247   : > { %v1166_v57 = vadd.f32 %v1165_v54, %v1164_v50  ;;  %v1170_v58 = vadd.f32 %v1169_v55, %v1151_v51  ;;  %v1152_v59 = vmax.f32 %v1146_v56, 0.0  ;;  %v1162_v11 = vadd.f32 %v1161_v3, %v1160_v60 }
 0x249   : > { %v1171_v61 = vrot.slane %v1170_v58, 2  ;;  %1156 = vst [vmem:[%s2139_s18 + $0x18] sm:$0xff] %v1152_v59  ;;  %v1175_v62 = vrot.slane %v1152_v59, 4  ;;  %v1167_v63 = vrot.slane %v1166_v57, 1  ;;  %s1694_s18 = sshll.u32 %s1757_s9, 4  ;;  %s1695_s18 = int_to_ptr.vmem [resolvable:$false] %s1694_s18 }
 0x24a   : > { %s1696_s25 = scalar_lea.vmem %s1695_s18, 128  ;;  %p1697_p0 = scmp.lt.s32.totalorder %s1311_s23, %s1695_s18 }
 0x24b   : > { %v1172_v0 = vadd.f32 %v1171_v61, %v1170_v58  ;;  %v1176_v2 = vadd.f32 %v1175_v62, %v1152_v59  ;;  %v1168_v9 = vadd.f32 %v1167_v63, %v1166_v57  ;;  %p1698_p1 = scmp.lt.s32.totalorder %s1696_s25, %s1690_s13 }
 0x24d   : > { %v1173_v5 = vrot.slane %v1172_v0, 1  ;;  %v1177_v7 = vrot.slane %v1176_v2, 2  ;;  %v1209_v13 = vsel %vm1208_vm7, %v1168_v9, %v1162_v11  ;;  %p1699_p2 = por %p1698_p1, %p1697_p0 }
 0x24f   : > { %v1178_v8 = vadd.f32 %v1177_v7, %v1176_v2  ;;  %v1174_v10 = vadd.f32 %v1173_v5, %v1172_v0  ;;  %p1700_p3 = pnand %p1699_p2, %p1693_p13 }
 0x251   : > { %v1179_v1 = vrot.slane %v1178_v8, 1  ;;  %v1211_v14 = vsel %vm1210_vm8, %v1174_v10, %v1209_v13 }
 0x253   : > { %v1180_v12 = vadd.f32 %v1179_v1, %v1178_v8 }
 0x255   : > { %v1213_v15 = vsel %vm1212_vm9, %v1180_v12, %v1211_v14 }
 0x256   : > { %1597 = vmatmul.mubr.f32.vlgmr.msra.gmra.mxu0 %v1213_v15 }
 0x316   : > { %v1281_v17 = vpop.f32.mrf.mxu0 }
 0x317   : > { %v1282_v6 = vadd.f32 %v1479_v16, %v1281_v17 }
 0x318   : > { %v1598_v18 = vpop.f32.mrf.mxu0 }
 0x319   : > { %1286 = vst.msk [vmem:[%s309_s22] sm:$0xf] %vm1285_vm10, %v1282_v6 }
 0x31a   : > { %1703 = shalt.err (!%p1700_p3)
}
 0x31b   : > { %s1704_s21 = scalar_lea.hbm %s2153_s10, 64  ;;  %s1708_s20 = scalar_lea.hbm %s2196_s8, 128 }
 0x31c   : > { %p1705_p4 = scmp.ne.s32.totalorder %s2153_s10, %s1704_s21  ;;  %p1709_p9 = scmp.lt.s32.totalorder %s2153_s10, %s2196_s8 }
 0x31d   : > { %p1710_p10 = scmp.lt.s32.totalorder %s1708_s20, %s1704_s21 }
 0x31e   : > { %p1706_p7 = pnand %p1705_p4, %p1841_p5 }
 0x31f   : > { %p1711_p11 = por %p1710_p10, %p1709_p9 }
 0x320   : > { %p1707_p8 = pneg %p1706_p7 }
 0x322   : > { %p1712_p12 = pnand %p1711_p11, %p1707_p8 }
 0x324   : > { %1715 = shalt.err (!%p1712_p12)
}
 0x325   : > { %1599 = dma.vmem_to_hbm [thread:$0]  (%p1841_p5), %s1311_s23, 64, %s2153_s10, %s1293_s12  }
 0x326 PF: > { %p1605_p13 = scmp.ge.s32.totalorder %s1750_s30, 2  ;;  %s1330_s26 = sand.u32 1, %s1738_s27  }
 0x327   : > { %s1331_s13 = scalar_lea.sflag [#allocation3], %s1330_s26 }
 0x328   : > { %p1602_p0 = pnand %p1605_p13, %p1845_p6 }
 0x32a   : > { %p1603_p1 = pneg %p1602_p0 }
 0x32c   : > { %1733 = dma.done.wait (%p1603_p1), %s1331_s13, 64  }
 0x32d   : > { %1735 = vsyncadd (%p1603_p1), %s1331_s13, 4294967232  ;;  %p19_p2 = scmp.ge.s32.totalorder %s1828_s11, 4   ;;  %s2201_s27 = smov %s1742_s28 }
 0x32e   : > { %s2202_s28 = smov %s1746_s29  ;;  %s2203_s29 = smov %s1839_s14 }
 0x32f   : > { %s2204_s30 = smov %s1828_s11  ;;  %21 = sbr.rel (!%p19_p2) target bundleno = 3 (0x3), region = 96 }
 0x334   :  { %1336 = vsyncpa [#allocation3], 1 }
 0x335   :  { %1338 = vsyncpa [#allocation3 + $0x1], 1 }

</bundles_post_ra>
